<compile_context>
chip_gen: v7x
topology: tpu7x:2x2x1
jax: 0.10.0
libtpu: 0.0.40
codegen_flags: <defaults>
</compile_context>

<pallas_src>
import functools

import jax
import jax.numpy as jnp
from jax.experimental import pallas as pl
from jax.experimental.pallas import tpu as pltpu


def _round_up(x, m):
    return ((x + m - 1) // m) * m


def _sublane_multiple(dtype):
    itemsize = jnp.dtype(dtype).itemsize
    return {4: 8, 2: 16, 1: 32}.get(itemsize, 8)


def _vmem_budget_bytes():
    """Per-generation VMEM budget for kernel buffers (also vmem_limit_bytes)."""
    cap = 64 * 1024 * 1024
    try:
        info = pltpu.get_tpu_info()
        cap = int(getattr(info, "vmem_capacity_bytes", cap) or cap)
    except Exception:
        pass
    if cap >= 128 * 1024 * 1024:            # v5e / v6e: 128 MiB physical VMEM
        return 96 * 1024 * 1024
    # v7x: 64 MiB per TensorCore -> leave pipeline headroom
    return min(44 * 1024 * 1024, int(cap * 0.7))


def _pick_tile_r(R, in_cols, out_cols, act_itemsize, resident_bytes,
                 sublane, budget, max_tile=2048):
    """Largest row tile whose pipelined blocks fit the VMEM budget.

    src/out blocks are double-buffered; +out_cols*4 covers the f32 matmul
    intermediate; +8 covers the double-buffered (tile_r, 1) int32 mask block.
    """
    per_row = 2 * (in_cols + out_cols) * act_itemsize + out_cols * 4 + 8
    avail = max(int(budget * 0.75) - resident_bytes, per_row * sublane)
    tile = avail // per_row
    tile = min(tile, max_tile, _round_up(R, sublane))
    tile = max(sublane, (tile // sublane) * sublane)
    return int(tile)


def _resident_spec(shape, index_map):
    """Constant-index block (weight/bias): fetched once; single-buffer it."""
    try:
        return pl.BlockSpec(shape, index_map, pipeline_mode=pl.Buffered(1))
    except (AttributeError, TypeError):
        return pl.BlockSpec(shape, index_map)


# ---------------------------------------------------------------------------
# Kernel (shared body; `has_mask` / `per_branch` are baked in via partial)
# ---------------------------------------------------------------------------
def _mb_kernel(has_mask, per_branch, *refs):
    """Fused masked_fill(padding_mask, 1) + Linear on one row tile.

    block-diag mode:
      src (TILE_R, E_pad), [mask (TILE_R, 1)], W (E_pad, E_pad), b (1, E_pad)
    per-branch mode (grid = (num_branches, row_tiles), branch outermost):
      src (TILE_R, d),     [mask (TILE_R, 1)], W (1, d, d),      b (1, 1, d)
    """
    if has_mask:
        src_ref, mask_ref, w_ref, b_ref, out_ref = refs
    else:
        src_ref, w_ref, b_ref, out_ref = refs
        mask_ref = None

    x = src_ref[...]
    if mask_ref is not None:
        # masked_fill(mask.unsqueeze(2), 1)
        x = jnp.where(mask_ref[...] != 0, jnp.asarray(1.0, dtype=x.dtype), x)

    if per_branch:
        w = w_ref[0]          # (d, d)        activation dtype
        b = b_ref[0]          # (1, d)        f32 (pre-cast at pack time)
    else:
        w = w_ref[...]        # (E_pad, E_pad)
        b = b_ref[...]        # (1, E_pad)    f32

    y = jnp.dot(x, w, preferred_element_type=jnp.float32)
    out_ref[...] = (y + b).astype(out_ref.dtype)


# ---------------------------------------------------------------------------
# One-time parameter packing (hoisted out of the forward path)
# ---------------------------------------------------------------------------
def prepare_multibranch_params(branch_params, embed_dim_list, dtype=jnp.float32):
    """Pack per-branch Linear params once.

    branch_params: list of (w_i, b_i) with w_i shaped (d_i, d_i) in
    (in_features, out_features) orientation (transpose torch Linear weights).
    `dtype` should match the activation dtype (bf16 weights for bf16
    activations -> pure bf16 MXU matmul).  Biases are stored in f32 since the
    matmul accumulates in f32.
    """
    E = int(sum(embed_dim_list))
    d0 = int(embed_dim_list[0])
    per_branch = all(int(d) == d0 for d in embed_dim_list) and d0 % 128 == 0

    if per_branch:
        # Stacked (B, d, d) weights -> per-branch matmuls on a branch grid axis.
        # TODO(synk): on v6e/v7x (2x256x256 MXU) pairs of d=128 branches could
        # be packed into 256-wide block-diagonal tiles; skipped since the
        # kernel is HBM-bound and the MXU has slack.
        W = jnp.stack([jnp.asarray(w, dtype) for (w, _) in branch_params])
        b = jnp.stack([jnp.asarray(bb, jnp.float32) for (_, bb) in branch_params])
        return dict(mode="per_branch", W=W, b=b[:, None, :], E=E, d=d0,
                    num_branches=len(embed_dim_list))

    # Fallback: block-diagonal ExE weight, padded to a lane multiple only when
    # E itself is not 128-aligned (pad lives on the weight, packed once here).
    # TODO(synk): unequal-but-128-multiple branch dims still take this dense
    # path (sum(d_i)^2 MACs instead of sum(d_i^2)); a ragged per-branch grid
    # would need per-branch block widths.
    E_pad = _round_up(E, 128)
    W = jnp.zeros((E_pad, E_pad), dtype)
    b = jnp.zeros((E_pad,), jnp.float32)
    start = 0
    for (w_i, b_i), d in zip(branch_params, embed_dim_list):
        W = W.at[start:start + d, start:start + d].set(jnp.asarray(w_i, dtype))
        b = b.at[start:start + d].set(jnp.asarray(b_i, jnp.float32))
        start += d
    return dict(mode="block_diag", W=W, b=b[None, :], E=E, E_pad=E_pad)


# ---------------------------------------------------------------------------
# Forward
# ---------------------------------------------------------------------------
def multibranch_forward(src_pos, reference_points, src, spatial_shapes,
                        level_start_index, padding_mask, params,
                        embed_dim_list, incremental_state=None,
                        max_tile_r=2048):
    """JAX/Pallas equivalent of MultiBranch.forward (generic-branch path).

    src_pos / reference_points / spatial_shapes / level_start_index are
    accepted for interface parity; they are only consumed by the MSDeformAttn
    branch type.
    """
    # TODO(synk): the MSDeformAttn branch type (deformable attention sampling)
    # has no clean Pallas equivalent here; only the generic masked_fill +
    # Linear branch path is implemented.
    bsz, tgt_len, embed_size = src.shape
    assert int(sum(embed_dim_list)) == embed_size == params["E"]

    dtype = src.dtype
    act_itemsize = jnp.dtype(dtype).itemsize
    sublane = _sublane_multiple(dtype)
    R = bsz * tgt_len
    budget = _vmem_budget_bytes()
    has_mask = padding_mask is not None

    src2 = src.reshape(R, embed_size)                 # free (row-major split)
    if has_mask:
        mask2 = padding_mask.reshape(R, 1).astype(jnp.int32)

    kernel = functools.partial(_mb_kernel, has_mask,
                               params["mode"] == "per_branch")
    w_itemsize = jnp.dtype(params["W"].dtype).itemsize

    if params["mode"] == "block_diag":
        E_pad = params["E_pad"]
        if E_pad != embed_size:
            # Only the E axis is ever padded (and only when E % 128 != 0);
            # rows are handled by the ragged last grid tile.
            src2 = jnp.pad(src2, ((0, 0), (0, E_pad - embed_size)))

        resident = E_pad * E_pad * w_itemsize + E_pad * 4   # single-buffered
        tile_r = _pick_tile_r(R, E_pad, E_pad, act_itemsize, resident,
                              sublane, budget, max_tile_r)
        grid = (pl.cdiv(R, tile_r),)

        in_specs = [pl.BlockSpec((tile_r, E_pad), lambda i: (i, 0))]
        operands = [src2]
        if has_mask:
            in_specs.append(pl.BlockSpec((tile_r, 1), lambda i: (i, 0)))
            operands.append(mask2)
        # Constant-index weight / bias: DMA'd once, kept VMEM-resident.
        in_specs += [_resident_spec((E_pad, E_pad), lambda i: (0, 0)),
                     _resident_spec((1, E_pad), lambda i: (0, 0))]
        operands += [params["W"], params["b"]]

        out = pl.pallas_call(
            kernel,
            out_shape=jax.ShapeDtypeStruct((R, E_pad), dtype),
            grid=grid,
            in_specs=in_specs,
            out_specs=pl.BlockSpec((tile_r, E_pad), lambda i: (i, 0)),
            compiler_params=pltpu.CompilerParams(
                dimension_semantics=("parallel",),
                vmem_limit_bytes=budget),
        )(*operands)

        if E_pad != embed_size:
            out = out[:, :embed_size]
        return out.reshape(bsz, tgt_len, embed_size)

    # ---- per-branch path: grid = (branch, row_tiles); branch axis OUTERMOST
    # so each (d, d) weight is DMA'd once per full row sweep.
    d = params["d"]
    nb = params["num_branches"]
    resident = 2 * d * d * w_itemsize + 2 * d * 4       # double-buffered W/b
    tile_r = _pick_tile_r(R, d, d, act_itemsize, resident, sublane, budget,
                          max_tile_r)
    grid = (nb, pl.cdiv(R, tile_r))

    in_specs = [pl.BlockSpec((tile_r, d), lambda j, i: (i, j))]
    operands = [src2]
    if has_mask:
        in_specs.append(pl.BlockSpec((tile_r, 1), lambda j, i: (i, 0)))
        operands.append(mask2)
    in_specs += [pl.BlockSpec((1, d, d), lambda j, i: (j, 0, 0)),
                 pl.BlockSpec((1, 1, d), lambda j, i: (j, 0, 0))]
    operands += [params["W"], params["b"]]

    out = pl.pallas_call(
        kernel,
        out_shape=jax.ShapeDtypeStruct((R, embed_size), dtype),
        grid=grid,
        in_specs=in_specs,
        out_specs=pl.BlockSpec((tile_r, d), lambda j, i: (i, j)),
        compiler_params=pltpu.CompilerParams(
            dimension_semantics=("parallel", "parallel"),
            vmem_limit_bytes=budget),
    )(*operands)

    return out.reshape(bsz, tgt_len, embed_size)


# ---------------------------------------------------------------------------
# Pure-JAX reference mirroring the PyTorch per-branch loop
# ---------------------------------------------------------------------------
def _reference_forward(src, padding_mask, branch_params, embed_dim_list):
    outs = []
    start = 0
    for (w_i, b_i), d in zip(branch_params, embed_dim_list):
        chunk = src[..., start:start + d]
        start += d
        if padding_mask is not None:
            chunk = jnp.where(padding_mask[..., None], 1.0, chunk)
        outs.append(chunk @ w_i + b_i)
    return jnp.concatenate(outs, axis=-1)


if __name__ == "__main__":
    key = jax.random.PRNGKey(0)
    k = jax.random.split(key, 12)

    # ---- Test 1: small embed (E=32 -> block-diagonal path, E padded to 128)
    bsz, tgt_len, embed_size = 2, 8, 32
    embed_dim_list = [16, 16]

    src = jax.random.normal(k[0], (bsz, tgt_len, embed_size), jnp.float32)
    src_pos = jax.random.normal(k[1], (bsz, tgt_len, embed_size), jnp.float32)
    reference_points = jax.random.uniform(k[2], (bsz, tgt_len, 1, 2), jnp.float32)
    spatial_shapes = jnp.array([[2, 4]], jnp.int32)
    level_start_index = jnp.array([0], jnp.int32)
    padding_mask = jax.random.bernoulli(k[3], 0.25, (bsz, tgt_len))

    branch_params = [
        (0.1 * jax.random.normal(k[4], (16, 16), jnp.float32),
         0.01 * jax.random.normal(k[5], (16,), jnp.float32)),
        (0.1 * jax.random.normal(k[6], (16, 16), jnp.float32),
         0.01 * jax.random.normal(k[7], (16,), jnp.float32)),
    ]
    params = prepare_multibranch_params(branch_params, embed_dim_list, jnp.float32)

    out = multibranch_forward(src_pos, reference_points, src, spatial_shapes,
                              level_start_index, padding_mask, params,
                              embed_dim_list)
    out = jax.block_until_ready(out)
    ref = _reference_forward(src, padding_mask, branch_params, embed_dim_list)
    assert out.shape == (bsz, tgt_len, embed_size)
    assert jnp.allclose(out, ref, atol=1e-4, rtol=1e-4)

    # padding_mask=None -> masked-select skipped entirely
    out_nm = multibranch_forward(src_pos, reference_points, src, spatial_shapes,
                                 level_start_index, None, params, embed_dim_list)
    ref_nm = _reference_forward(src, None, branch_params, embed_dim_list)
    assert jnp.allclose(jax.block_until_ready(out_nm), ref_nm,
                        atol=1e-4, rtol=1e-4)

    # ---- Test 2: lane-aligned branch chunks (d=128) -> per-branch path,
    #              no padding / slicing anywhere (branch-outer grid).
    embed_dim_list2 = [128, 128]
    embed_size2 = sum(embed_dim_list2)
    src_l = jax.random.normal(k[8], (bsz, tgt_len, embed_size2), jnp.float32)
    padding_mask2 = jax.random.bernoulli(k[9], 0.25, (bsz, tgt_len))
    kk = jax.random.split(k[10], 4)
    branch_params2 = [
        (0.1 * jax.random.normal(kk[0], (128, 128), jnp.float32),
         0.01 * jax.random.normal(kk[1], (128,), jnp.float32)),
        (0.1 * jax.random.normal(kk[2], (128, 128), jnp.float32),
         0.01 * jax.random.normal(kk[3], (128,), jnp.float32)),
    ]
    params2 = prepare_multibranch_params(branch_params2, embed_dim_list2,
                                         jnp.float32)
    out2 = multibranch_forward(jnp.zeros_like(src_l), reference_points, src_l,
                               spatial_shapes, level_start_index, padding_mask2,
                               params2, embed_dim_list2)
    out2 = jax.block_until_ready(out2)
    ref2 = _reference_forward(src_l, padding_mask2, branch_params2,
                              embed_dim_list2)
    assert out2.shape == (bsz, tgt_len, embed_size2)
    assert jnp.allclose(out2, ref2, atol=1e-3, rtol=1e-3)

    # ---- Test 3: bf16 activations + bf16 weights (sublane-16 row tiles,
    #              pure-bf16 MXU matmul with f32 accumulation).
    src_bf = src_l.astype(jnp.bfloat16)
    params_bf = prepare_multibranch_params(branch_params2, embed_dim_list2,
                                           jnp.bfloat16)
    out_bf = multibranch_forward(jnp.zeros_like(src_bf), reference_points,
                                 src_bf, spatial_shapes, level_start_index,
                                 padding_mask2, params_bf, embed_dim_list2)
    out_bf = jax.block_until_ready(out_bf)
    assert out_bf.dtype == jnp.bfloat16
    bf_branch_params = [(w.astype(jnp.bfloat16).astype(jnp.float32),
                         b.astype(jnp.float32)) for (w, b) in branch_params2]
    ref_bf = _reference_forward(src_bf.astype(jnp.float32), padding_mask2,
                                bf_branch_params, embed_dim_list2)
    assert jnp.allclose(out_bf.astype(jnp.float32), ref_bf,
                        atol=3e-2, rtol=3e-2)

    print("KERNEL_OK")
</pallas_src>

<mosaic_0001>
module attributes {stable_mosaic.version = 11 : i64} {
  func.func @_mb_kernel(%arg0: i32, %arg1: memref<16x128xf32, #tpu.memory_space<vmem>>, %arg2: memref<16x1xi32, #tpu.memory_space<vmem>>, %arg3: memref<128x128xf32, #tpu.memory_space<vmem>>, %arg4: memref<1x128xf32, #tpu.memory_space<vmem>>, %arg5: memref<16x128xf32, #tpu.memory_space<vmem>>) attributes {dimension_semantics = [#tpu.dimension_semantics<parallel>], iteration_bounds = array<i64: 1>, scalar_prefetch = 0 : i64, scratch_operands = 0 : i64, tpu.core_type = #tpu.core_type<tc>, window_params = [{transform_indices = @transform_0, window_bounds = array<i64: 16, 128>}, {transform_indices = @transform_1, window_bounds = array<i64: 16, 1>}, {pipeline_mode = #tpu.pipeline_mode<synchronous>, transform_indices = @transform_2, window_bounds = array<i64: 128, 128>}, {pipeline_mode = #tpu.pipeline_mode<synchronous>, transform_indices = @transform_3, window_bounds = array<i64: 1, 128>}, {transform_indices = @transform_4, window_bounds = array<i64: 16, 128>}]} {
    %c0 = arith.constant 0 : index
    %c0_0 = arith.constant 0 : index
    %0 = vector.load %arg1[%c0, %c0_0] : memref<16x128xf32, #tpu.memory_space<vmem>>, vector<16x128xf32>
    %c0_1 = arith.constant 0 : index
    %c0_2 = arith.constant 0 : index
    %1 = vector.load %arg2[%c0_1, %c0_2] : memref<16x1xi32, #tpu.memory_space<vmem>>, vector<16x1xi32>
    %c0_i32 = arith.constant 0 : i32
    %2 = vector.broadcast %c0_i32 : i32 to vector<16x1xi32>
    %3 = arith.cmpi ne, %1, %2 : vector<16x1xi32>
    %cst = arith.constant 1.000000e+00 : f32
    %4 = vector.shape_cast %3 : vector<16x1xi1> to vector<16x1xi1>
    %5 = vector.broadcast %4 : vector<16x1xi1> to vector<16x128xi1>
    %6 = vector.broadcast %cst : f32 to vector<16x128xf32>
    %7 = arith.select %5, %6, %0 : vector<16x128xi1>, vector<16x128xf32>
    %c0_3 = arith.constant 0 : index
    %c0_4 = arith.constant 0 : index
    %8 = vector.load %arg3[%c0_3, %c0_4] : memref<128x128xf32, #tpu.memory_space<vmem>>, vector<128x128xf32>
    %c0_5 = arith.constant 0 : index
    %c0_6 = arith.constant 0 : index
    %9 = vector.load %arg4[%c0_5, %c0_6] : memref<1x128xf32, #tpu.memory_space<vmem>>, vector<1x128xf32>
    %cst_7 = arith.constant dense<0.000000e+00> : vector<16x128xf32>
    %10 = tpu.matmul %7, %8, %cst_7 {dimension_numbers = #tpu.dot_dimension_numbers<[1], [0], [0], [1], [0, 0, 1, 1], [], []>} : vector<16x128xf32>, vector<128x128xf32>, vector<16x128xf32> -> vector<16x128xf32>
    %11 = vector.broadcast %9 : vector<1x128xf32> to vector<16x128xf32>
    %12 = arith.addf %10, %11 : vector<16x128xf32>
    %c0_8 = arith.constant 0 : index
    %c0_9 = arith.constant 0 : index
    %13 = vector.load %arg5[%c0_8, %c0_9] : memref<16x128xf32, #tpu.memory_space<vmem>>, vector<16x128xf32>
    tpu.vector_store %arg5[%c0_8, %c0_9], %12 {strides = array<i32>} : memref<16x128xf32, #tpu.memory_space<vmem>>, vector<16x128xf32>,
    return
  }
  func.func @transform_0(%arg0: i32) -> (i32, i32) {
    %c0_i32 = arith.constant 0 : i32
    %c0_i32_0 = arith.constant 0 : i32
    return %arg0, %c0_i32 : i32, i32
  }
  func.func @transform_1(%arg0: i32) -> (i32, i32) {
    %c0_i32 = arith.constant 0 : i32
    %c0_i32_0 = arith.constant 0 : i32
    return %arg0, %c0_i32 : i32, i32
  }
  func.func @transform_2(%arg0: i32) -> (i32, i32) {
    %c0_i32 = arith.constant 0 : i32
    %c0_i32_0 = arith.constant 0 : i32
    %c0_i32_1 = arith.constant 0 : i32
    return %c0_i32, %c0_i32_0 : i32, i32
  }
  func.func @transform_3(%arg0: i32) -> (i32, i32) {
    %c0_i32 = arith.constant 0 : i32
    %c0_i32_0 = arith.constant 0 : i32
    %c0_i32_1 = arith.constant 0 : i32
    return %c0_i32, %c0_i32_0 : i32, i32
  }
  func.func @transform_4(%arg0: i32) -> (i32, i32) {
    %c0_i32 = arith.constant 0 : i32
    %c0_i32_0 = arith.constant 0 : i32
    return %arg0, %c0_i32 : i32, i32
  }
}

</mosaic_0001>

<bundles_post_ra>
// kernel: tpu_custom_call.1
= control target key start
LH: loop header
LB: loop body
LE: loop exit
PB: predicated region body
PF: predicated region fallthrough
CT: control target
= control target key end

     0   :  { %9 = vsyncpa [#allocation3], 0  ;;  %s382_s0 = inlined_call_operand.vmem [shape: f32[16,128], index: 0, kind: input, shape index: {}]   ;;  %s383_s1 = inlined_call_operand.vmem [shape: s32[16,1], index: 1, kind: input, shape index: {}]   ;;  %s384_s2 = inlined_call_operand.hbm [shape: f32[128,128], index: 2, kind: input, shape index: {}]   ;;  %s385_s3 = inlined_call_operand.vmem [shape: f32[1,128], index: 3, kind: input, shape index: {}]   ;;  %s386_s4 = inlined_call_operand.hbm [shape: f32[16,128], index: 4, kind: output, shape index: {}]  }
   0x1   :  { %10 = vsyncpa [#allocation4], 0  ;;  %s307_s15 = smov [#allocation2]   ;;  %s259_s19 = scalar_lea.hbm %s384_s2, 2048 }
   0x2   :  { %s20_s16 = sshll.u32 %s307_s15, 4  ;;  %p260_p0 = scmp.ne.s32.totalorder %s384_s2, %s259_s19  ;;  %s21_s16 = int_to_ptr.vmem [resolvable:$true] %s20_s16 }
   0x3   :  { %p263_p1 = scmp.lt.u32.totalorder %s259_s19, %s384_s2 }
   0x5   :  { %p265_p2 = pnand %p263_p1, %p260_p0 }
   0x7   :  { %268 = shalt.err (!%p265_p2)
}
   0x8   :  { %s269_s24 = scalar_lea.vmem %s21_s16, 2048  ;;  %p274_p4 = scmp.lt.s32.totalorder %s21_s16, %s21_s16 }
   0x9   :  { %p270_p3 = scmp.ne.s32.totalorder %s21_s16, %s269_s24  ;;  %p275_p5 = scmp.lt.s32.totalorder %s269_s24, %s269_s24 }
   0xb   :  { %p276_p6 = por %p275_p5, %p274_p4 }
   0xd   :  { %p277_p7 = pnand %p276_p6, %p270_p3 }
   0xf   :  { %280 = shalt.err (!%p277_p7)
}
  0x10   :  { %s308_s25 = smov 128   ;;  %s309_s26 = smov 8  }
  0x11   :  { %26 = dma.hbm_to_vmem [thread:$0]  %s384_s2, 2048, %s21_s16, [#allocation3], %s308_s25, %s308_s25, %s309_s26  }
  0x12   :  { %303 = dma.done.wait [#allocation3], 2048  }
  0x13   :  { %304 = vsyncadd [#allocation3], 4294965248  ;;  %v310_v0 = vmov 0   ;;  %v34_v1 = vld [vmem:[%s383_s1] sm:$0xff]  ;;  %v35_v2 = vld [vmem:[%s383_s1 + $0x8] sm:$0xff]  ;;  %s311_s11 = smov [#allocation5]  }
  0x14   :  { %258 = vset.pattern.permute.xlu0 %v310_v0  ;;  %v50_v3 = vld [vmem:[#allocation2] sm:$0xff]  ;;  %vm36_vm0 = vcmp.ne.s32.totalorder %v34_v1, 0  ;;  %vm37_vm1 = vcmp.ne.s32.totalorder %v35_v2, 0  ;;  %v51_v4 = vld [vmem:[#allocation2 + $0x8] sm:$0xff]  ;;  %v52_v5 = vld [vmem:[#allocation2 + $0x10] sm:$0xff]  ;;  %s155_s12 = sshll.u32 %s311_s11, 4  ;;  %s156_s12 = int_to_ptr.vmem [resolvable:$true] %s155_s12 }
  0x15   :  { %v53_v6 = vld [vmem:[#allocation2 + $0x18] sm:$0xff]  ;;  %v38_v7 = vsel %vm36_vm0, 1, %v310_v0  ;;  %v221_v8 = vpack.c.bf16 %v51_v4, %v50_v3  ;;  %v54_v10 = vld [vmem:[#allocation2 + $0x20] sm:$0xff]  ;;  %v55_v11 = vld [vmem:[#allocation2 + $0x28] sm:$0xff]  ;;  %v39_v12 = vsel %vm37_vm1, 1, %v310_v0  ;;  %s281_s13 = scalar_lea.vmem %s156_s12, 256  ;;  %p286_p9 = scmp.lt.s32.totalorder %s156_s12, %s156_s12 }
  0x16   :  { %v225_v9 = vpack.c.bf16 %v53_v6, %v52_v5  ;;  %41 = vperm.xlu0 %258, %v38_v7   ;;  %v229_v13 = vpack.c.bf16 %v55_v11, %v54_v10  ;;  %v56_v14 = vld [vmem:[#allocation2 + $0x30] sm:$0xff]  ;;  %v57_v15 = vld [vmem:[#allocation2 + $0x38] sm:$0xff]  ;;  %v58_v17 = vld [vmem:[#allocation2 + $0x40] sm:$0xff]  ;;  %p282_p8 = scmp.ne.s32.totalorder %s156_s12, %s281_s13  ;;  %p287_p10 = scmp.lt.s32.totalorder %s281_s13, %s281_s13 }
  0x17   :  { %222 = vmatprep.subr.bf16.mxu0 %v221_v8  ;;  %v233_v16 = vpack.c.bf16 %v57_v15, %v56_v14  ;;  %v59_v18 = vld [vmem:[#allocation2 + $0x48] sm:$0xff]  ;;  %v60_v20 = vld [vmem:[#allocation2 + $0x50] sm:$0xff]  ;;  %v61_v21 = vld [vmem:[#allocation2 + $0x58] sm:$0xff] }
  0x18   :  { %224 = vmatpush3.bf16.msra.mxu0 %v221_v8  ;;  %v237_v19 = vpack.c.bf16 %v59_v18, %v58_v17  ;;  %v241_v22 = vpack.c.bf16 %v61_v21, %v60_v20  ;;  %v62_v23 = vld [vmem:[#allocation2 + $0x60] sm:$0xff]  ;;  %v63_v24 = vld [vmem:[#allocation2 + $0x68] sm:$0xff]  ;;  %v64_v26 = vld [vmem:[#allocation2 + $0x70] sm:$0xff]  ;;  %p288_p11 = por %p287_p10, %p286_p9 }
  0x19   :  { %226 = vmatprep.subr.bf16.mxu0 %v225_v9  ;;  %v245_v25 = vpack.c.bf16 %v63_v24, %v62_v23  ;;  %v65_v27 = vld [vmem:[#allocation2 + $0x78] sm:$0xff]  ;;  %v32_v29 = vld [vmem:[%s382_s0] sm:$0xff]  ;;  %v33_v32 = vld [vmem:[%s382_s0 + $0x8] sm:$0xff] }
  0x1a   :  { %44 = vperm.xlu0 %258, %v39_v12   ;;  %v249_v28 = vpack.c.bf16 %v65_v27, %v64_v26  ;;  %v167_v35 = vld [vmem:[%s385_s3] ss:$0 sm:$0xff]  ;;  %p289_p12 = pnand %p288_p11, %p282_p8 }
  0x1c   :  { %228 = vmatpush3.bf16.msra.mxu0 %v225_v9 }
  0x1d   :  { %230 = vmatprep.subr.bf16.mxu0 %v229_v13 }
  0x20   :  { %232 = vmatpush3.bf16.msra.mxu0 %v229_v13 }
  0x21   :  { %234 = vmatprep.subr.bf16.mxu0 %v233_v16 }
  0x24   :  { %236 = vmatpush3.bf16.msra.mxu0 %v233_v16 }
  0x25   :  { %238 = vmatprep.subr.bf16.mxu0 %v237_v19 }
  0x28   :  { %240 = vmatpush3.bf16.msra.mxu0 %v237_v19 }
  0x29   :  { %242 = vmatprep.subr.bf16.mxu0 %v241_v22 }
  0x2c   :  { %244 = vmatpush3.bf16.msra.mxu0 %v241_v22 }
  0x2d   :  { %246 = vmatprep.subr.bf16.mxu0 %v245_v25 }
  0x30   :  { %248 = vmatpush3.bf16.msra.mxu0 %v245_v25 }
  0x31   :  { %250 = vmatprep.subr.bf16.mxu0 %v249_v28 }
  0x34   :  { %252 = vmatpush3.bf16.msra.mxu0 %v249_v28 }
  0x95   :  { %v42_v30 = vpop.permute.xlu0 %41 }
  0x96   :  { %vm46_vm2 = vcmp.eq.s32.totalorder %v42_v30, 1 }
  0x97   :  { %v48_v31 = vsel %vm46_vm2, 1.0, %v32_v29 }
  0x98   :  { %218 = vmatprep.mubr.f32.mxu0 %v48_v31 }
  0x99   :  { %v45_v33 = vpop.permute.xlu0 %44 }
  0x9a   :  { %vm47_vm3 = vcmp.eq.s32.totalorder %v45_v33, 1 }
  0x9b   :  { %v49_v34 = vsel %vm47_vm3, 1.0, %v33_v32 }
  0x9c   :  { %219 = vmatmul.mubr.f32.vlgmr.msra.gmra.mrb[0].mxu0 %v49_v34 }
 0x16f   :  { %v220_v36 = vpop.f32.mrb[0].mxu0 }
 0x170   :  { %v145_v37 = vadd.f32 %v220_v36, %v167_v35  ;;  %v139_v38 = vpop.f32.mrb[1].mxu0 }
 0x171   :  { %v140_v39 = vadd.f32 %v167_v35, %v139_v38 }
 0x172   :  { %149 = vst [vmem:[#allocation5 + $0x8] sm:$0xff] %v145_v37 }
 0x173   :  { %148 = vst [vmem:[#allocation5] sm:$0xff] %v140_v39 }
 0x174   :  { %292 = shalt.err (!%p289_p12)
}
 0x175   :  { %s293_s3 = scalar_lea.hbm %s386_s4, 256 }
 0x176   :  { %p294_p13 = scmp.ne.s32.totalorder %s386_s4, %s293_s3  ;;  %p297_p0 = scmp.lt.u32.totalorder %s293_s3, %s386_s4 }
 0x178   :  { %p299_p1 = pnand %p297_p0, %p294_p13 }
 0x17a   :  { %302 = shalt.err (!%p299_p1)
}
 0x17b   :  { %161 = dma.vmem_to_hbm [thread:$0]  %s156_s12, 256, %s386_s4, [#allocation4], %s308_s25, %s308_s25, %s309_s26  }
 0x17c   :  { %305 = dma.done.wait [#allocation4], 256  }
 0x17d   :  { %306 = vsyncadd [#allocation4], 4294967040 }
 0x17e   :  { %165 = vsyncpa [#allocation3], 1 }
 0x17f   :  { %166 = vsyncpa [#allocation4], 1 }

</bundles_post_ra>
